<compile_context>
chip_gen: v6e
topology: v6e:2x2x1
jax: 0.10.0
libtpu: 0.0.40
codegen_flags: <defaults>
</compile_context>

<pallas_src>
import jax
import jax.numpy as jnp
from jax import lax
from jax.experimental import pallas as pl
from jax.experimental.pallas import tpu as pltpu


def _round_up(x, m):
    return ((x + m - 1) // m) * m


def _gather_rows_kernel(labels_ref, table_hbm, out_ref, rows_vmem, sems):
    """Gather R table rows for this grid step with up to K outstanding DMAs.

    labels_ref : SMEM (n_pad,) int32       -- scalar-prefetched labels
    table_hbm  : HBM  (num_rows, hidden)   -- raw HBM ref (pl.ANY)
    out_ref    : VMEM (R, hidden)          -- output block for this step
    rows_vmem  : VMEM (R, hidden) scratch  -- DMA landing buffer
    sems       : DMA semaphores, shape (K,)
    """
    i = pl.program_id(0)
    rows_per_block = rows_vmem.shape[0]
    num_slots = sems.shape[0]
    base = i * rows_per_block

    def row_copy(src_row, dst_row, slot):
        # All row copies have identical (1, hidden) shape, so a descriptor
        # built with placeholder indices is valid for .wait() on any slot.
        return pltpu.make_async_copy(
            table_hbm.at[pl.ds(src_row, 1), :],
            rows_vmem.at[pl.ds(dst_row, 1), :],
            sems.at[slot],
        )

    def issue(r, carry):
        slot = r % num_slots

        # Retire the copy that last used this slot before reusing its sem,
        # keeping up to `num_slots` row DMAs in flight.
        @pl.when(r >= num_slots)
        def _():
            row_copy(0, 0, slot).wait()

        row_copy(labels_ref[base + r], r, slot).start()
        return carry

    lax.fori_loop(0, rows_per_block, issue, 0)

    # Drain the remaining in-flight copies (each used slot exactly once).
    for slot in range(min(rows_per_block, num_slots)):
        row_copy(0, 0, slot).wait()

    # Single dense (R, hidden) store -> one large, unmasked writeback DMA.
    out_ref[...] = rows_vmem[...]


def label_embedder_forward(labels, embedding_table, *, rows_per_block=128,
                           dma_slots=8):
    """Equivalent of LabelEmbedder.forward: embedding_table[labels]."""
    orig_shape = labels.shape
    num_rows, hidden = embedding_table.shape
    dtype = embedding_table.dtype
    itemsize = jnp.dtype(dtype).itemsize

    flat = labels.reshape(-1).astype(jnp.int32)
    n = flat.shape[0]
    if n == 0:  # empty batch: avoid a zero-length grid
        return jnp.zeros((*orig_shape, hidden), dtype)

    # Defensive clamp: an out-of-range label must never become an OOB DMA.
    # (nn.Embedding would raise; in-range inputs are unaffected.)
    flat = jnp.clip(flat, 0, num_rows - 1)

    # R labels per grid step; multiple of 8 (f32 sublanes) for dense stores,
    # capped so tiny batches are not wildly over-padded.
    rows = min(rows_per_block, _round_up(n, 8))
    rows = _round_up(rows, 8)
    n_pad = _round_up(n, rows)
    num_blocks = n_pad // rows
    slots = min(dma_slots, rows)

    # Pad with label 0 (a valid row) so every row of the last block is written.
    padded = jnp.pad(flat, (0, n_pad - n))

    grid_spec = pltpu.PrefetchScalarGridSpec(
        num_scalar_prefetch=1,                       # labels -> SMEM
        grid=(num_blocks,),
        in_specs=[
            # Table stays in HBM; rows are gathered with manual DMAs.
            pl.BlockSpec(memory_space=pl.ANY),
        ],
        out_specs=pl.BlockSpec((rows, hidden), lambda i, lbl: (i, 0)),
        scratch_shapes=[
            pltpu.VMEM((rows, hidden), dtype),       # DMA landing buffer
            pltpu.SemaphoreType.DMA((slots,)),       # K outstanding row DMAs
        ],
    )

    cost = pl.CostEstimate(
        flops=0,
        transcendentals=0,
        # HBM row reads + output writes + label bytes (pure memory traffic).
        bytes_accessed=2 * n_pad * hidden * itemsize + n_pad * 4,
    )

    out = pl.pallas_call(
        _gather_rows_kernel,
        out_shape=jax.ShapeDtypeStruct((n_pad, hidden), dtype),
        grid_spec=grid_spec,
        compiler_params=pltpu.CompilerParams(
            dimension_semantics=("parallel",),       # row-block granularity
        ),
        cost_estimate=cost,
    )(padded, embedding_table)

    # TODO(synk): add a VMEM-resident-table fast path (stage table once into a
    # persistent scratch) for workloads with many / duplicate labels.
    return out[:n].reshape(*orig_shape, hidden)


if __name__ == "__main__":
    key = jax.random.PRNGKey(0)
    num_classes = 10
    hidden_size = 128   # lane-dense (multiple of 128), like real DiT widths
    batch = 8

    k_table, k_labels = jax.random.split(key)
    # Matches the PyTorch module literally: nn.init.normal_(weight, 0.02)
    # positionally sets mean=0.02, std=1.0.
    embedding_table = (
        jax.random.normal(k_table, (num_classes + 1, hidden_size), jnp.float32)
        + 0.02
    )
    labels = jax.random.randint(
        k_labels, (batch,), 0, num_classes + 1, dtype=jnp.int32
    )

    fwd = jax.jit(label_embedder_forward)
    out = jax.block_until_ready(fwd(labels, embedding_table))

    ref = embedding_table[labels]
    assert out.shape == (batch, hidden_size), out.shape
    assert out.dtype == jnp.float32
    assert bool(jnp.array_equal(out, ref)), "mismatch vs. reference lookup"

    print("KERNEL_OK")
</pallas_src>

<mosaic_0001>
module attributes {stable_mosaic.version = 11 : i64} {
  func.func @_gather_rows_kernel(%arg0: i32, %arg1: memref<8xi32, #tpu.memory_space<smem>>, %arg2: memref<11x128xf32, #tpu.memory_space<any>>, %arg3: memref<8x128xf32, #tpu.memory_space<vmem>>, %arg4: memref<8x128xf32, #tpu.memory_space<vmem>>, %arg5: memref<8x!tpu.dma_semaphore, #tpu.memory_space<semaphore_mem>>) attributes {dimension_semantics = [#tpu.dimension_semantics<parallel>], iteration_bounds = array<i64: 1>, scalar_prefetch = 1 : i64, scratch_operands = 2 : i64, tpu.core_type = #tpu.core_type<tc>, window_params = [{}, {transform_indices = @transform_1, window_bounds = array<i64: 8, 128>}]} {
    %c8_i32 = arith.constant 8 : i32
    %0 = arith.muli %arg0, %c8_i32 : i32
    %c0_i32 = arith.constant 0 : i32
    %c8_i32_0 = arith.constant 8 : i32
    %1 = arith.addi %c0_i32, %c8_i32_0 : i32
    %c1_i32 = arith.constant 1 : i32
    scf.for %arg6 = %c0_i32 to %1 step %c1_i32  : i32 {
      %c8_i32_39 = arith.constant 8 : i32
      %c0_i32_40 = arith.constant 0 : i32
      %36 = arith.cmpi eq, %c8_i32_39, %c0_i32_40 : i32
      %c1_i32_41 = arith.constant 1 : i32
      %37 = arith.select %36, %c1_i32_41, %c8_i32_39 : i32
      %38 = arith.remsi %arg6, %37 : i32
      %c0_i32_42 = arith.constant 0 : i32
      %39 = arith.cmpi ne, %38, %c0_i32_42 : i32
      %c0_i32_43 = arith.constant 0 : i32
      %40 = arith.cmpi slt, %38, %c0_i32_43 : i32
      %c0_i32_44 = arith.constant 0 : i32
      %41 = arith.cmpi slt, %37, %c0_i32_44 : i32
      %42 = arith.xori %40, %41 : i1
      %43 = arith.andi %42, %39 : i1
      %44 = arith.addi %38, %37 : i32
      %45 = arith.select %43, %44, %38 : i32
      %c8_i32_45 = arith.constant 8 : i32
      %46 = arith.cmpi sge, %arg6, %c8_i32_45 : i32
      %47 = arith.extui %46 : i1 to i32
      %c0_i32_46 = arith.constant 0 : i32
      %48 = arith.cmpi ne, %47, %c0_i32_46 : i32
      scf.if %48 {
        %c0_i32_49 = arith.constant 0 : i32
        %c0_i32_50 = arith.constant 0 : i32
        %56 = tpu.memref_slice %arg2[%c0_i32_49, %c0_i32_50] : memref<11x128xf32, #tpu.memory_space<any>> -> memref<1x128xf32, #tpu.memory_space<any>>
        %c0_i32_51 = arith.constant 0 : i32
        %c0_i32_52 = arith.constant 0 : i32
        %57 = tpu.memref_slice %arg4[%c0_i32_51, %c0_i32_52] : memref<8x128xf32, #tpu.memory_space<vmem>> -> memref<1x128xf32, #tpu.memory_space<vmem>>
        %58 = tpu.memref_slice %arg5[%45] : memref<8x!tpu.dma_semaphore, #tpu.memory_space<semaphore_mem>> -> memref<1x!tpu.dma_semaphore, #tpu.memory_space<semaphore_mem>>
        %59 = tpu.memref_squeeze %58 : memref<1x!tpu.dma_semaphore, #tpu.memory_space<semaphore_mem>> -> memref<!tpu.dma_semaphore, #tpu.memory_space<semaphore_mem>>
        tpu.wait_dma2 semaphore(%59 : memref<!tpu.dma_semaphore, #tpu.memory_space<semaphore_mem>>) src(%56 : memref<1x128xf32, #tpu.memory_space<any>>) dst(%57 : memref<1x128xf32, #tpu.memory_space<vmem>>)
      } else {
      }
      %49 = arith.addi %0, %arg6 : i32
      %50 = arith.index_cast %49 : i32 to index
      %51 = memref.load %arg1[%50] : memref<8xi32, #tpu.memory_space<smem>>
      %c0_i32_47 = arith.constant 0 : i32
      %52 = tpu.memref_slice %arg2[%51, %c0_i32_47] : memref<11x128xf32, #tpu.memory_space<any>> -> memref<1x128xf32, #tpu.memory_space<any>>
      %c0_i32_48 = arith.constant 0 : i32
      %53 = tpu.memref_slice %arg4[%arg6, %c0_i32_48] : memref<8x128xf32, #tpu.memory_space<vmem>> -> memref<1x128xf32, #tpu.memory_space<vmem>>
      %54 = tpu.memref_slice %arg5[%45] : memref<8x!tpu.dma_semaphore, #tpu.memory_space<semaphore_mem>> -> memref<1x!tpu.dma_semaphore, #tpu.memory_space<semaphore_mem>>
      %55 = tpu.memref_squeeze %54 : memref<1x!tpu.dma_semaphore, #tpu.memory_space<semaphore_mem>> -> memref<!tpu.dma_semaphore, #tpu.memory_space<semaphore_mem>>
      tpu.enqueue_dma source(%52 : memref<1x128xf32, #tpu.memory_space<any>>) target(%53 : memref<1x128xf32, #tpu.memory_space<vmem>>) target_semaphore(%55 : memref<!tpu.dma_semaphore, #tpu.memory_space<semaphore_mem>>)
    }
    %c8_i32_1 = arith.constant 8 : i32
    %c0_i32_2 = arith.constant 0 : i32
    %c0_i32_3 = arith.constant 0 : i32
    %c0_i32_4 = arith.constant 0 : i32
    %2 = tpu.memref_slice %arg2[%c0_i32_3, %c0_i32_4] : memref<11x128xf32, #tpu.memory_space<any>> -> memref<1x128xf32, #tpu.memory_space<any>>
    %c0_i32_5 = arith.constant 0 : i32
    %c0_i32_6 = arith.constant 0 : i32
    %3 = tpu.memref_slice %arg4[%c0_i32_5, %c0_i32_6] : memref<8x128xf32, #tpu.memory_space<vmem>> -> memref<1x128xf32, #tpu.memory_space<vmem>>
    %4 = tpu.memref_slice %arg5[%c0_i32_2] : memref<8x!tpu.dma_semaphore, #tpu.memory_space<semaphore_mem>> -> memref<1x!tpu.dma_semaphore, #tpu.memory_space<semaphore_mem>>
    %5 = tpu.memref_squeeze %4 : memref<1x!tpu.dma_semaphore, #tpu.memory_space<semaphore_mem>> -> memref<!tpu.dma_semaphore, #tpu.memory_space<semaphore_mem>>
    tpu.wait_dma2 semaphore(%5 : memref<!tpu.dma_semaphore, #tpu.memory_space<semaphore_mem>>) src(%2 : memref<1x128xf32, #tpu.memory_space<any>>) dst(%3 : memref<1x128xf32, #tpu.memory_space<vmem>>)
    %c1_i32_7 = arith.constant 1 : i32
    %c0_i32_8 = arith.constant 0 : i32
    %c0_i32_9 = arith.constant 0 : i32
    %6 = tpu.memref_slice %arg2[%c0_i32_8, %c0_i32_9] : memref<11x128xf32, #tpu.memory_space<any>> -> memref<1x128xf32, #tpu.memory_space<any>>
    %c0_i32_10 = arith.constant 0 : i32
    %c0_i32_11 = arith.constant 0 : i32
    %7 = tpu.memref_slice %arg4[%c0_i32_10, %c0_i32_11] : memref<8x128xf32, #tpu.memory_space<vmem>> -> memref<1x128xf32, #tpu.memory_space<vmem>>
    %8 = tpu.memref_slice %arg5[%c1_i32_7] : memref<8x!tpu.dma_semaphore, #tpu.memory_space<semaphore_mem>> -> memref<1x!tpu.dma_semaphore, #tpu.memory_space<semaphore_mem>>
    %9 = tpu.memref_squeeze %8 : memref<1x!tpu.dma_semaphore, #tpu.memory_space<semaphore_mem>> -> memref<!tpu.dma_semaphore, #tpu.memory_space<semaphore_mem>>
    tpu.wait_dma2 semaphore(%9 : memref<!tpu.dma_semaphore, #tpu.memory_space<semaphore_mem>>) src(%6 : memref<1x128xf32, #tpu.memory_space<any>>) dst(%7 : memref<1x128xf32, #tpu.memory_space<vmem>>)
    %c2_i32 = arith.constant 2 : i32
    %c0_i32_12 = arith.constant 0 : i32
    %c0_i32_13 = arith.constant 0 : i32
    %10 = tpu.memref_slice %arg2[%c0_i32_12, %c0_i32_13] : memref<11x128xf32, #tpu.memory_space<any>> -> memref<1x128xf32, #tpu.memory_space<any>>
    %c0_i32_14 = arith.constant 0 : i32
    %c0_i32_15 = arith.constant 0 : i32
    %11 = tpu.memref_slice %arg4[%c0_i32_14, %c0_i32_15] : memref<8x128xf32, #tpu.memory_space<vmem>> -> memref<1x128xf32, #tpu.memory_space<vmem>>
    %12 = tpu.memref_slice %arg5[%c2_i32] : memref<8x!tpu.dma_semaphore, #tpu.memory_space<semaphore_mem>> -> memref<1x!tpu.dma_semaphore, #tpu.memory_space<semaphore_mem>>
    %13 = tpu.memref_squeeze %12 : memref<1x!tpu.dma_semaphore, #tpu.memory_space<semaphore_mem>> -> memref<!tpu.dma_semaphore, #tpu.memory_space<semaphore_mem>>
    tpu.wait_dma2 semaphore(%13 : memref<!tpu.dma_semaphore, #tpu.memory_space<semaphore_mem>>) src(%10 : memref<1x128xf32, #tpu.memory_space<any>>) dst(%11 : memref<1x128xf32, #tpu.memory_space<vmem>>)
    %c3_i32 = arith.constant 3 : i32
    %c0_i32_16 = arith.constant 0 : i32
    %c0_i32_17 = arith.constant 0 : i32
    %14 = tpu.memref_slice %arg2[%c0_i32_16, %c0_i32_17] : memref<11x128xf32, #tpu.memory_space<any>> -> memref<1x128xf32, #tpu.memory_space<any>>
    %c0_i32_18 = arith.constant 0 : i32
    %c0_i32_19 = arith.constant 0 : i32
    %15 = tpu.memref_slice %arg4[%c0_i32_18, %c0_i32_19] : memref<8x128xf32, #tpu.memory_space<vmem>> -> memref<1x128xf32, #tpu.memory_space<vmem>>
    %16 = tpu.memref_slice %arg5[%c3_i32] : memref<8x!tpu.dma_semaphore, #tpu.memory_space<semaphore_mem>> -> memref<1x!tpu.dma_semaphore, #tpu.memory_space<semaphore_mem>>
    %17 = tpu.memref_squeeze %16 : memref<1x!tpu.dma_semaphore, #tpu.memory_space<semaphore_mem>> -> memref<!tpu.dma_semaphore, #tpu.memory_space<semaphore_mem>>
    tpu.wait_dma2 semaphore(%17 : memref<!tpu.dma_semaphore, #tpu.memory_space<semaphore_mem>>) src(%14 : memref<1x128xf32, #tpu.memory_space<any>>) dst(%15 : memref<1x128xf32, #tpu.memory_space<vmem>>)
    %c4_i32 = arith.constant 4 : i32
    %c0_i32_20 = arith.constant 0 : i32
    %c0_i32_21 = arith.constant 0 : i32
    %18 = tpu.memref_slice %arg2[%c0_i32_20, %c0_i32_21] : memref<11x128xf32, #tpu.memory_space<any>> -> memref<1x128xf32, #tpu.memory_space<any>>
    %c0_i32_22 = arith.constant 0 : i32
    %c0_i32_23 = arith.constant 0 : i32
    %19 = tpu.memref_slice %arg4[%c0_i32_22, %c0_i32_23] : memref<8x128xf32, #tpu.memory_space<vmem>> -> memref<1x128xf32, #tpu.memory_space<vmem>>
    %20 = tpu.memref_slice %arg5[%c4_i32] : memref<8x!tpu.dma_semaphore, #tpu.memory_space<semaphore_mem>> -> memref<1x!tpu.dma_semaphore, #tpu.memory_space<semaphore_mem>>
    %21 = tpu.memref_squeeze %20 : memref<1x!tpu.dma_semaphore, #tpu.memory_space<semaphore_mem>> -> memref<!tpu.dma_semaphore, #tpu.memory_space<semaphore_mem>>
    tpu.wait_dma2 semaphore(%21 : memref<!tpu.dma_semaphore, #tpu.memory_space<semaphore_mem>>) src(%18 : memref<1x128xf32, #tpu.memory_space<any>>) dst(%19 : memref<1x128xf32, #tpu.memory_space<vmem>>)
    %c5_i32 = arith.constant 5 : i32
    %c0_i32_24 = arith.constant 0 : i32
    %c0_i32_25 = arith.constant 0 : i32
    %22 = tpu.memref_slice %arg2[%c0_i32_24, %c0_i32_25] : memref<11x128xf32, #tpu.memory_space<any>> -> memref<1x128xf32, #tpu.memory_space<any>>
    %c0_i32_26 = arith.constant 0 : i32
    %c0_i32_27 = arith.constant 0 : i32
    %23 = tpu.memref_slice %arg4[%c0_i32_26, %c0_i32_27] : memref<8x128xf32, #tpu.memory_space<vmem>> -> memref<1x128xf32, #tpu.memory_space<vmem>>
    %24 = tpu.memref_slice %arg5[%c5_i32] : memref<8x!tpu.dma_semaphore, #tpu.memory_space<semaphore_mem>> -> memref<1x!tpu.dma_semaphore, #tpu.memory_space<semaphore_mem>>
    %25 = tpu.memref_squeeze %24 : memref<1x!tpu.dma_semaphore, #tpu.memory_space<semaphore_mem>> -> memref<!tpu.dma_semaphore, #tpu.memory_space<semaphore_mem>>
    tpu.wait_dma2 semaphore(%25 : memref<!tpu.dma_semaphore, #tpu.memory_space<semaphore_mem>>) src(%22 : memref<1x128xf32, #tpu.memory_space<any>>) dst(%23 : memref<1x128xf32, #tpu.memory_space<vmem>>)
    %c6_i32 = arith.constant 6 : i32
    %c0_i32_28 = arith.constant 0 : i32
    %c0_i32_29 = arith.constant 0 : i32
    %26 = tpu.memref_slice %arg2[%c0_i32_28, %c0_i32_29] : memref<11x128xf32, #tpu.memory_space<any>> -> memref<1x128xf32, #tpu.memory_space<any>>
    %c0_i32_30 = arith.constant 0 : i32
    %c0_i32_31 = arith.constant 0 : i32
    %27 = tpu.memref_slice %arg4[%c0_i32_30, %c0_i32_31] : memref<8x128xf32, #tpu.memory_space<vmem>> -> memref<1x128xf32, #tpu.memory_space<vmem>>
    %28 = tpu.memref_slice %arg5[%c6_i32] : memref<8x!tpu.dma_semaphore, #tpu.memory_space<semaphore_mem>> -> memref<1x!tpu.dma_semaphore, #tpu.memory_space<semaphore_mem>>
    %29 = tpu.memref_squeeze %28 : memref<1x!tpu.dma_semaphore, #tpu.memory_space<semaphore_mem>> -> memref<!tpu.dma_semaphore, #tpu.memory_space<semaphore_mem>>
    tpu.wait_dma2 semaphore(%29 : memref<!tpu.dma_semaphore, #tpu.memory_space<semaphore_mem>>) src(%26 : memref<1x128xf32, #tpu.memory_space<any>>) dst(%27 : memref<1x128xf32, #tpu.memory_space<vmem>>)
    %c7_i32 = arith.constant 7 : i32
    %c0_i32_32 = arith.constant 0 : i32
    %c0_i32_33 = arith.constant 0 : i32
    %30 = tpu.memref_slice %arg2[%c0_i32_32, %c0_i32_33] : memref<11x128xf32, #tpu.memory_space<any>> -> memref<1x128xf32, #tpu.memory_space<any>>
    %c0_i32_34 = arith.constant 0 : i32
    %c0_i32_35 = arith.constant 0 : i32
    %31 = tpu.memref_slice %arg4[%c0_i32_34, %c0_i32_35] : memref<8x128xf32, #tpu.memory_space<vmem>> -> memref<1x128xf32, #tpu.memory_space<vmem>>
    %32 = tpu.memref_slice %arg5[%c7_i32] : memref<8x!tpu.dma_semaphore, #tpu.memory_space<semaphore_mem>> -> memref<1x!tpu.dma_semaphore, #tpu.memory_space<semaphore_mem>>
    %33 = tpu.memref_squeeze %32 : memref<1x!tpu.dma_semaphore, #tpu.memory_space<semaphore_mem>> -> memref<!tpu.dma_semaphore, #tpu.memory_space<semaphore_mem>>
    tpu.wait_dma2 semaphore(%33 : memref<!tpu.dma_semaphore, #tpu.memory_space<semaphore_mem>>) src(%30 : memref<1x128xf32, #tpu.memory_space<any>>) dst(%31 : memref<1x128xf32, #tpu.memory_space<vmem>>)
    %c0 = arith.constant 0 : index
    %c0_36 = arith.constant 0 : index
    %34 = vector.load %arg4[%c0, %c0_36] : memref<8x128xf32, #tpu.memory_space<vmem>>, vector<8x128xf32>
    %c0_37 = arith.constant 0 : index
    %c0_38 = arith.constant 0 : index
    %35 = vector.load %arg3[%c0_37, %c0_38] : memref<8x128xf32, #tpu.memory_space<vmem>>, vector<8x128xf32>
    tpu.vector_store %arg3[%c0_37, %c0_38], %34 {strides = array<i32>} : memref<8x128xf32, #tpu.memory_space<vmem>>, vector<8x128xf32>,
    return
  }
  func.func @transform_1(%arg0: i32, %arg1: memref<8xi32, #tpu.memory_space<smem>>) -> (i32, i32) {
    %c0_i32 = arith.constant 0 : i32
    %c0_i32_0 = arith.constant 0 : i32
    return %arg0, %c0_i32 : i32, i32
  }
}

</mosaic_0001>

<bundles_post_ra>
// kernel: label_embedder_forward.1
= control target key start
LH: loop header
LB: loop body
LE: loop exit
PB: predicated region body
PF: predicated region fallthrough
CT: control target
= control target key end

     0   :  { %s327_s0 = inlined_call_operand.vmem [shape: s32[8], index: 0, kind: input, shape index: {}]   ;;  %s328_s1 = inlined_call_operand.hbm [shape: f32[11,128], index: 1, kind: input, shape index: {}]   ;;  %s329_s2 = inlined_call_operand.hbm [shape: f32[8,128], index: 2, kind: output, shape index: {}]  }
   0x1   :  { %s7_s11 = sshll.u32 %s327_s0, 4  ;;  %s8_s11 = int_to_ptr.vmem [resolvable:$true] %s7_s11 }
   0x2   :  { %s189_s12 = scalar_lea.vmem %s8_s11, 16  ;;  %p194_p1 = scmp.lt.s32.totalorder %s8_s11, %s8_s11 }
   0x3   :  { %p190_p0 = scmp.ne.s32.totalorder %s8_s11, %s189_s12  ;;  %p195_p2 = scmp.lt.s32.totalorder %s189_s12, %s189_s12 }
   0x5   :  { %p196_p3 = por %p195_p2, %p194_p1 }
   0x7   :  { %p197_p4 = pnand %p196_p3, %p190_p0 }
   0x9   :  { %200 = shalt.err (!%p197_p4)  }
   0xa   :  { %s275_s13 = smov [#allocation5]  }
   0xb   :  { %10 = dma.vmem_to_smem %s8_s11, 16, %s275_s13, [#allocation4] }
   0xc   :  { %247 = dma.done.wait [#allocation4], 16 }
   0xd   :  { %248 = vsyncadd [#allocation4], 4294967280 }
   0xe   :  { %12 = sfence }
   0xf   :  { %13 = vsyncpa [#allocation7], 0  ;;  %s296_s14 = smov 0  }
  0x10 LB: > { %p21_p5 = scmp.lt.s32.totalorder %s273_s14, 0  ;;  %s22_s0 = ssub.s32 0, %s273_s14  ;;  %s273_s14 = sphi %s296_s14, %s20_s14  }
  0x11   : > { %s163_s15 = smin.u32 %s273_s14, %s22_s0  ;;  %p178_p6 = scmp.ge.s32.totalorder %s273_s14, 8 }
  0x12   : > { %s24_s16 = sand.u32 7, %s163_s15  }
  0x13   : > { %s25_s17 = ssub.s32 0, %s24_s16 }
  0x14   : > { %s331_s17 = smov (!%p21_p5, %s25_s17), %s24_s16 }
  0x15   : > { %p165_p7 = scmp.lt.s32.totalorder %s331_s17, 0  ;;  %s31_s18 = sadd.s32 8, %s331_s17 }
  0x17   : > { %s333_s18 = smov (!%p165_p7, %s31_s18), %s331_s17 }
  0x18   : > { %s305_s19 = scalar_lea.sflag [#allocation3], %s333_s18 }
  0x19   : > { %250 = dma.done.wait (%p178_p6), %s305_s19, 16 }
  0x1a   : > { %252 = vsyncadd (%p178_p6), %s305_s19, 4294967280  ;;  %s42_s20 = sld [smem:[#allocation5 + %s273_s14]]  ;;  %s45_s21 = scalar_lea.vmem [#allocation2], %s273_s14 }
  0x1b   : > { %s54_s22 = sshll.u32 %s45_s21, 4  ;;  %s203_s30 = scalar_lea.hbm %s328_s1, 256  ;;  %s55_s22 = int_to_ptr.vmem [resolvable:$true] %s54_s22 }
  0x20   : > { %s167_s23 = sshll.u32 %s42_s20, 4 }
  0x21   : > { %s44_s26 = scalar_lea.hbm %s328_s1, %s167_s23 }
  0x22   : > { %s201_s27 = scalar_lea.hbm %s44_s26, 16  ;;  %p204_p9 = scmp.lt.s32.totalorder %s44_s26, %s328_s1 }
  0x23   : > { %p202_p8 = scmp.ne.s32.totalorder %s44_s26, %s201_s27  ;;  %p205_p10 = scmp.lt.s32.totalorder %s203_s30, %s201_s27 }
  0x25   : > { %p206_p11 = por %p205_p10, %p204_p9 }
  0x27   : > { %p207_p12 = pnand %p206_p11, %p202_p8 }
  0x29   : > { %210 = shalt.err (!%p207_p12)  }
  0x2a   : > { %s211_s5 = scalar_lea.vmem %s55_s22, 16  ;;  %s276_s6 = smov [#allocation2]  }
  0x2b   : > { %p212_p13 = scmp.ne.s32.totalorder %s55_s22, %s211_s5  ;;  %s213_s7 = sshll.u32 %s276_s6, 4  ;;  %s214_s7 = int_to_ptr.vmem [resolvable:$false] %s213_s7 }
  0x2c   : > { %s215_s8 = scalar_lea.vmem %s214_s7, 128  ;;  %p216_p0 = scmp.lt.s32.totalorder %s55_s22, %s214_s7 }
  0x2d   : > { %p217_p1 = scmp.lt.s32.totalorder %s215_s8, %s211_s5 }
  0x2f   : > { %p218_p2 = por %p217_p1, %p216_p0 }
  0x31   : > { %p219_p3 = pnand %p218_p2, %p212_p13 }
  0x33   : > { %222 = shalt.err (!%p219_p3)  }
  0x34   : > { %57 = dma.hbm_to_vmem [thread:$0]  %s44_s26, 16, %s55_s22, %s305_s19 }
  0x35   : > { %s20_s14 = sadd.s32 1, %s273_s14  }
  0x36   : > { %p17_p4 = scmp.ge.s32.totalorder %s20_s14, 8  }
  0x38   :  { %19 = sbr.rel (!%p17_p4) target bundleno = 16 (0x10), region = 53 }
  0x3d   :  { %253 = dma.done.wait [#allocation3], 16 }
  0x3e   :  { %254 = vsyncadd [#allocation3], 4294967280 }
  0x3f   :  { %255 = dma.done.wait [#allocation3 + $0x1], 16 }
  0x40   :  { %256 = vsyncadd [#allocation3 + $0x1], 4294967280 }
  0x41   :  { %257 = dma.done.wait [#allocation3 + $0x2], 16 }
  0x42   :  { %258 = vsyncadd [#allocation3 + $0x2], 4294967280 }
  0x43   :  { %259 = dma.done.wait [#allocation3 + $0x3], 16 }
  0x44   :  { %260 = vsyncadd [#allocation3 + $0x3], 4294967280 }
  0x45   :  { %261 = dma.done.wait [#allocation3 + $0x4], 16 }
  0x46   :  { %262 = vsyncadd [#allocation3 + $0x4], 4294967280 }
  0x47   :  { %263 = dma.done.wait [#allocation3 + $0x5], 16 }
  0x48   :  { %264 = vsyncadd [#allocation3 + $0x5], 4294967280 }
  0x49   :  { %265 = dma.done.wait [#allocation3 + $0x6], 16 }
  0x4a   :  { %266 = vsyncadd [#allocation3 + $0x6], 4294967280 }
  0x4b   :  { %267 = dma.done.wait [#allocation3 + $0x7], 16 }
  0x4c   :  { %268 = vsyncadd [#allocation3 + $0x7], 4294967280  ;;  %s277_s9 = smov [#allocation6]   ;;  %v82_v0 = vld [vmem:[#allocation2] sm:$0xff] }
  0x4d   :  { %s90_s10 = sshll.u32 %s277_s9, 4  ;;  %83 = vst [vmem:[#allocation6] sm:$0xff] %v82_v0  ;;  %s91_s10 = int_to_ptr.vmem [resolvable:$true] %s90_s10 }
  0x4e   :  { %s223_s1 = scalar_lea.vmem %s91_s10, 128  ;;  %p228_p6 = scmp.lt.s32.totalorder %s91_s10, %s91_s10 }
  0x4f   :  { %p224_p5 = scmp.ne.s32.totalorder %s91_s10, %s223_s1  ;;  %p229_p7 = scmp.lt.s32.totalorder %s223_s1, %s223_s1 }
  0x51   :  { %p230_p8 = por %p229_p7, %p228_p6 }
  0x53   :  { %p231_p9 = pnand %p230_p8, %p224_p5 }
  0x55   :  { %234 = shalt.err (!%p231_p9)
}
  0x56   :  { %93 = dma.vmem_to_hbm [thread:$0]  %s91_s10, 128, %s329_s2, [#allocation7]  }
  0x57   :  { %269 = dma.done.wait [#allocation7], 128  }
  0x58   :  { %270 = vsyncadd [#allocation7], 4294967168 }
  0x59   :  { %97 = vsyncpa [#allocation7], 1 }
  0x5a   :  { %98 = vsyncmov [#allocation3] }
  0x5d   :  { %s99_s13 = vpop.sfrf %98 }
  0x5e   :  { %p168_p10 = scmp.ne.s32.totalorder %s99_s13, 0 }
  0x60   :  { %103 = shalt.err (%p168_p10)  }
  0x61   :  { %105 = vsyncmov [#allocation3 + $0x1] }
  0x64   :  { %s106_s14 = vpop.sfrf %105 }
  0x65   :  { %p169_p11 = scmp.ne.s32.totalorder %s106_s14, 0 }
  0x67   :  { %110 = shalt.err (%p169_p11)  }
  0x68   :  { %112 = vsyncmov [#allocation3 + $0x2] }
  0x6b   :  { %s113_s0 = vpop.sfrf %112 }
  0x6c   :  { %p170_p12 = scmp.ne.s32.totalorder %s113_s0, 0 }
  0x6e   :  { %117 = shalt.err (%p170_p12)  }
  0x6f   :  { %119 = vsyncmov [#allocation3 + $0x3] }
  0x72   :  { %s120_s15 = vpop.sfrf %119 }
  0x73   :  { %p171_p13 = scmp.ne.s32.totalorder %s120_s15, 0 }
  0x75   :  { %124 = shalt.err (%p171_p13)  }
  0x76   :  { %126 = vsyncmov [#allocation3 + $0x4] }
  0x79   :  { %s127_s2 = vpop.sfrf %126 }
  0x7a   :  { %p172_p0 = scmp.ne.s32.totalorder %s127_s2, 0 }
  0x7c   :  { %131 = shalt.err (%p172_p0)  }
  0x7d   :  { %133 = vsyncmov [#allocation3 + $0x5] }
  0x80   :  { %s134_s16 = vpop.sfrf %133 }
  0x81   :  { %p173_p1 = scmp.ne.s32.totalorder %s134_s16, 0 }
  0x83   :  { %138 = shalt.err (%p173_p1)  }
  0x84   :  { %140 = vsyncmov [#allocation3 + $0x6] }
  0x87   :  { %s141_s17 = vpop.sfrf %140 }
  0x88   :  { %p174_p2 = scmp.ne.s32.totalorder %s141_s17, 0 }
  0x8a   :  { %145 = shalt.err (%p174_p2)  }
  0x8b   :  { %147 = vsyncmov [#allocation3 + $0x7] }
  0x8e   :  { %s148_s18 = vpop.sfrf %147 }
  0x8f   :  { %p175_p3 = scmp.ne.s32.totalorder %s148_s18, 0 }
  0x91   :  { %152 = shalt.err (%p175_p3)  }

</bundles_post_ra>
